<compile_context>
chip_gen: v7x
topology: tpu7x:2x2x1
jax: 0.10.0
libtpu: 0.0.40
codegen_flags: <defaults>
</compile_context>

<pallas_src>
import functools

import jax
import jax.numpy as jnp
from jax import lax
from jax.experimental import pallas as pl
from jax.experimental.pallas import tpu as pltpu


def _weighted_ce_kernel(y_ref, wy_ref, logits_ref, out_ref, *, n_total):
    """One batch tile: stable LSE + masked target gather -> partial (num, den).

    y_ref      : (TILE_N, 1) int32 targets, VMEM
    wy_ref     : (TILE_N, 1) f32   per-sample weights w[y], VMEM
    logits_ref : (TILE_N, C) logits (native dtype), VMEM
    out_ref    : (1, 2)      f32   [num_partial, den_partial], SMEM (per block)
    """
    i = pl.program_id(0)

    logits = logits_ref[...].astype(jnp.float32)            # (TILE_N, C)
    y = y_ref[...]                                           # (TILE_N, 1) int32
    w_y = wy_ref[...]                                        # (TILE_N, 1) f32

    tile_n, c = logits.shape

    # Validity of each row vs. the real batch size (last tile may be partial;
    # padded VMEM contents are undefined).  Only (TILE_N, 1) work.
    row_ids = i * tile_n + lax.broadcasted_iota(jnp.int32, (tile_n, 1), 0)
    row_valid = row_ids < n_total                            # (TILE_N, 1) bool

    # In-kernel one-hot: class index iota vs broadcast target id.
    class_ids = lax.broadcasted_iota(jnp.int32, (tile_n, c), 1)
    tgt_mask = class_ids == y                                # (TILE_N, C) bool

    # Numerically stable log-sum-exp along the class axis.
    m = jnp.max(logits, axis=-1, keepdims=True)              # (TILE_N, 1)
    lse = m + jnp.log(jnp.sum(jnp.exp(logits - m), axis=-1, keepdims=True))

    # Target logit via masked lane reduction (no log-prob tensor materialized).
    z_y = jnp.sum(jnp.where(tgt_mask, logits, 0.0), axis=-1, keepdims=True)

    # Mask only per-row scalars; selects stop NaN/Inf from padded rows.
    w_y = jnp.where(row_valid, w_y, 0.0)
    contrib = jnp.where(row_valid, w_y * (lse - z_y), 0.0)   # -w[y]*logp_y

    out_ref[0, 0] = jnp.sum(contrib)
    out_ref[0, 1] = jnp.sum(w_y)


def _round_up(x, m):
    return (x + m - 1) // m * m


def weighted_cross_entropy_loss(logits, y, class_weights, *, tile_n=None):
    """Batch-tiled pallas_call producing per-block (num, den); divide on host."""
    n, c = logits.shape
    itemsize = jnp.dtype(logits.dtype).itemsize
    sublane = {4: 8, 2: 16, 1: 32}.get(itemsize, 8)

    if tile_n is None:
        # Size tiles by bytes: ~2 MiB of native-dtype logits per tile, up to
        # 4096 rows, multiple of the packed-sublane size, never beyond the
        # (rounded) batch.
        budget_bytes = 2 * 1024 * 1024
        tile_n = budget_bytes // max(1, c * itemsize)
        tile_n = max(sublane, min(tile_n, 4096))
        tile_n = (tile_n // sublane) * sublane
        tile_n = min(tile_n, max(sublane, _round_up(n, sublane)))
    grid_n = pl.cdiv(n, tile_n)

    y2d = y.reshape(n, 1).astype(jnp.int32)
    # Per-sample weight gather in the wrapper (O(N), negligible HBM vs logits).
    w_y = class_weights.astype(jnp.float32)[y].reshape(n, 1)

    # Explicit VMEM budget: double-buffered native logits tile + ~3 full-tile
    # f32 intermediates (upcast, exp(logits-m), masked select) + small vectors.
    logits_tile_bytes = tile_n * c * itemsize
    f32_tile_bytes = tile_n * c * 4
    vmem_needed = 2 * logits_tile_bytes + 3 * f32_tile_bytes + 8 * tile_n * 4
    vmem_limit = int(min(48 * 1024 * 1024,
                         max(24 * 1024 * 1024, int(1.5 * vmem_needed))))

    kernel = functools.partial(_weighted_ce_kernel, n_total=n)

    partials = pl.pallas_call(
        kernel,
        out_shape=jax.ShapeDtypeStruct((grid_n, 2), jnp.float32),
        grid=(grid_n,),
        in_specs=[
            pl.BlockSpec((tile_n, 1), lambda i: (i, 0)),     # targets
            pl.BlockSpec((tile_n, 1), lambda i: (i, 0)),     # w[y] per sample
            pl.BlockSpec((tile_n, c), lambda i: (i, 0)),     # logits (native)
        ],
        # Independent per-block partials -> grid axis is parallel (v7x 2 TCs).
        out_specs=pl.BlockSpec((1, 2), lambda i: (i, 0), memory_space=pltpu.SMEM),
        compiler_params=pltpu.CompilerParams(
            dimension_semantics=("parallel",),
            vmem_limit_bytes=vmem_limit),
    )(y2d, w_y, logits)

    num = jnp.sum(partials[:, 0])
    den = jnp.sum(partials[:, 1])
    # Guard the all-zero-weight batch (0/0).
    return jnp.where(den != 0.0, num / den, jnp.float32(0.0))


def compute_balanced_class_weights(labels, num_classes):
    """Deterministic stand-in for BassWeightsCalculator: w_c = N / (C * count_c)."""
    counts = jnp.bincount(labels, length=num_classes).astype(jnp.float32)
    n = jnp.float32(labels.shape[0])
    return jnp.where(counts > 0.0,
                     n / (num_classes * jnp.maximum(counts, 1.0)),
                     0.0)


class WeightedCrossEntropyLossJAX:
    """Mirror of the PyTorch module: class weights fixed from labels at init."""

    def __init__(self, labels, num_classes):
        self.weights = compute_balanced_class_weights(labels, num_classes)

    def __call__(self, logits, y):
        return weighted_cross_entropy_loss(logits, y, self.weights)


def _reference_loss(logits, y, w):
    """Pure-JAX reference (matches torch CrossEntropyLoss w/ weight, mean)."""
    logp = jax.nn.log_softmax(logits.astype(jnp.float32), axis=-1)
    logp_y = jnp.take_along_axis(logp, y[:, None], axis=-1)[:, 0]
    w_y = w[y]
    return jnp.sum(-w_y * logp_y) / jnp.sum(w_y)


if __name__ == "__main__":
    key = jax.random.PRNGKey(0)
    k_logits, k_labels, k_y = jax.random.split(key, 3)

    N, C = 8, 32  # small demo shapes: batch=8, num_classes=32

    # "training labels" used at module init for class-weight computation
    init_labels = jax.random.randint(k_labels, (64,), 0, C, dtype=jnp.int32)

    # forward inputs (native dtype goes straight to the kernel)
    logits = jax.random.normal(k_logits, (N, C), dtype=jnp.float32)
    y = jax.random.randint(k_y, (N,), 0, C, dtype=jnp.int32)

    loss_mod = WeightedCrossEntropyLossJAX(init_labels, C)

    loss = loss_mod(logits, y)
    jax.block_until_ready(loss)

    # sanity check against pure-JAX reference
    ref = _reference_loss(logits, y, loss_mod.weights)
    assert jnp.allclose(loss, ref, rtol=1e-5, atol=1e-5), (loss, ref)

    print("KERNEL_OK")
</pallas_src>

<mosaic_0001>
module attributes {stable_mosaic.version = 11 : i64} {
  func.func @_weighted_ce_kernel(%arg0: i32, %arg1: memref<8x1xi32, #tpu.memory_space<vmem>>, %arg2: memref<8x1xf32, #tpu.memory_space<vmem>>, %arg3: memref<8x32xf32, #tpu.memory_space<vmem>>, %arg4: memref<1x2xf32, #tpu.memory_space<smem>>) attributes {dimension_semantics = [#tpu.dimension_semantics<parallel>], iteration_bounds = array<i64: 1>, scalar_prefetch = 0 : i64, scratch_operands = 0 : i64, tpu.core_type = #tpu.core_type<tc>, window_params = [{transform_indices = @transform_0, window_bounds = array<i64: 8, 1>}, {transform_indices = @transform_1, window_bounds = array<i64: 8, 1>}, {transform_indices = @transform_2, window_bounds = array<i64: 8, 32>}, {transform_indices = @transform_3, window_bounds = array<i64: 1, 2>}]} {
    %c0 = arith.constant 0 : index
    %c0_0 = arith.constant 0 : index
    %0 = vector.load %arg3[%c0, %c0_0] : memref<8x32xf32, #tpu.memory_space<vmem>>, vector<8x32xf32>
    %c0_1 = arith.constant 0 : index
    %c0_2 = arith.constant 0 : index
    %1 = vector.load %arg1[%c0_1, %c0_2] : memref<8x1xi32, #tpu.memory_space<vmem>>, vector<8x1xi32>
    %c0_3 = arith.constant 0 : index
    %c0_4 = arith.constant 0 : index
    %2 = vector.load %arg2[%c0_3, %c0_4] : memref<8x1xf32, #tpu.memory_space<vmem>>, vector<8x1xf32>
    %c8_i32 = arith.constant 8 : i32
    %3 = arith.muli %arg0, %c8_i32 : i32
    %4 = tpu.iota {dimensions = array<i32: 0>} : vector<8x1xi32>
    %5 = vector.broadcast %3 : i32 to vector<8x1xi32>
    %6 = arith.addi %5, %4 : vector<8x1xi32>
    %c8_i32_5 = arith.constant 8 : i32
    %7 = vector.broadcast %c8_i32_5 : i32 to vector<8x1xi32>
    %8 = arith.cmpi slt, %6, %7 : vector<8x1xi32>
    %9 = tpu.iota {dimensions = array<i32: 1>} : vector<8x32xi32>
    %10 = vector.broadcast %1 : vector<8x1xi32> to vector<8x32xi32>
    %11 = arith.cmpi eq, %9, %10 : vector<8x32xi32>
    %cst = arith.constant dense<0xFF800000> : vector<8xf32>
    %12 = vector.multi_reduction <maximumf>, %0, %cst [1] : vector<8x32xf32> to vector<8xf32>
    %13 = vector.shape_cast %12 : vector<8xf32> to vector<8x1xf32>
    %14 = vector.broadcast %13 : vector<8x1xf32> to vector<8x32xf32>
    %15 = arith.subf %0, %14 : vector<8x32xf32>
    %16 = math.exp %15 : vector<8x32xf32>
    %cst_6 = arith.constant dense<0.000000e+00> : vector<8xf32>
    %17 = vector.multi_reduction <add>, %16, %cst_6 [1] : vector<8x32xf32> to vector<8xf32>
    %18 = vector.shape_cast %17 : vector<8xf32> to vector<8x1xf32>
    %19 = math.log %18 : vector<8x1xf32>
    %20 = arith.addf %13, %19 : vector<8x1xf32>
    %cst_7 = arith.constant 0.000000e+00 : f32
    %21 = vector.broadcast %cst_7 : f32 to vector<8x32xf32>
    %22 = arith.select %11, %0, %21 : vector<8x32xi1>, vector<8x32xf32>
    %cst_8 = arith.constant dense<0.000000e+00> : vector<8xf32>
    %23 = vector.multi_reduction <add>, %22, %cst_8 [1] : vector<8x32xf32> to vector<8xf32>
    %24 = vector.shape_cast %23 : vector<8xf32> to vector<8x1xf32>
    %cst_9 = arith.constant 0.000000e+00 : f32
    %25 = vector.broadcast %cst_9 : f32 to vector<8x1xf32>
    %26 = arith.select %8, %2, %25 : vector<8x1xi1>, vector<8x1xf32>
    %27 = arith.subf %20, %24 : vector<8x1xf32>
    %28 = arith.mulf %26, %27 : vector<8x1xf32>
    %cst_10 = arith.constant 0.000000e+00 : f32
    %29 = vector.broadcast %cst_10 : f32 to vector<8x1xf32>
    %30 = arith.select %8, %28, %29 : vector<8x1xi1>, vector<8x1xf32>
    %31 = vector.shape_cast %30 : vector<8x1xf32> to vector<1x8x1xf32>
    %cst_11 = arith.constant dense<0.000000e+00> : vector<1xf32>
    %32 = vector.multi_reduction <add>, %31, %cst_11 [1, 2] : vector<1x8x1xf32> to vector<1xf32>
    %33 = vector.shape_cast %32 : vector<1xf32> to vector<1x1x1xf32>
    %34 = vector.extract %33[0, 0, 0] : f32 from vector<1x1x1xf32>
    %c0_12 = arith.constant 0 : index
    %c0_13 = arith.constant 0 : index
    %35 = memref.load %arg4[%c0_12, %c0_13] : memref<1x2xf32, #tpu.memory_space<smem>>
    memref.store %34, %arg4[%c0_12, %c0_13] : memref<1x2xf32, #tpu.memory_space<smem>>
    %36 = vector.shape_cast %26 : vector<8x1xf32> to vector<1x8x1xf32>
    %cst_14 = arith.constant dense<0.000000e+00> : vector<1xf32>
    %37 = vector.multi_reduction <add>, %36, %cst_14 [1, 2] : vector<1x8x1xf32> to vector<1xf32>
    %38 = vector.shape_cast %37 : vector<1xf32> to vector<1x1x1xf32>
    %39 = vector.extract %38[0, 0, 0] : f32 from vector<1x1x1xf32>
    %c0_15 = arith.constant 0 : index
    %c1 = arith.constant 1 : index
    %40 = memref.load %arg4[%c0_15, %c1] : memref<1x2xf32, #tpu.memory_space<smem>>
    memref.store %39, %arg4[%c0_15, %c1] : memref<1x2xf32, #tpu.memory_space<smem>>
    return
  }
  func.func @transform_0(%arg0: i32) -> (i32, i32) {
    %c0_i32 = arith.constant 0 : i32
    %c0_i32_0 = arith.constant 0 : i32
    return %arg0, %c0_i32 : i32, i32
  }
  func.func @transform_1(%arg0: i32) -> (i32, i32) {
    %c0_i32 = arith.constant 0 : i32
    %c0_i32_0 = arith.constant 0 : i32
    return %arg0, %c0_i32 : i32, i32
  }
  func.func @transform_2(%arg0: i32) -> (i32, i32) {
    %c0_i32 = arith.constant 0 : i32
    %c0_i32_0 = arith.constant 0 : i32
    return %arg0, %c0_i32 : i32, i32
  }
  func.func @transform_3(%arg0: i32) -> (i32, i32) {
    %c0_i32 = arith.constant 0 : i32
    %c0_i32_0 = arith.constant 0 : i32
    return %arg0, %c0_i32 : i32, i32
  }
}

</mosaic_0001>

<bundles_post_ra>
// kernel: tpu_custom_call.1
= control target key start
LH: loop header
LB: loop body
LE: loop exit
PB: predicated region body
PF: predicated region fallthrough
CT: control target
= control target key end

     0   :  { %vm30_vm0 = vcmask 261120   ;;  %s158_s0 = inlined_call_operand.vmem [shape: s32[8,1], index: 0, kind: input, shape index: {}]   ;;  %s159_s1 = inlined_call_operand.vmem [shape: f32[8,1], index: 1, kind: input, shape index: {}]   ;;  %s160_s2 = inlined_call_operand.vmem [shape: f32[8,32], index: 2, kind: input, shape index: {}]   ;;  %s161_s3 = inlined_call_operand.hbm [shape: f32[1,2], index: 3, kind: output, shape index: {}]  }
   0x1   :  { %v15_v0 = vld [vmem:[%s160_s2] sm:$0xff] }
   0x2   :  { %8 = vsyncpa [#allocation3], 0  ;;  %v31_v1 = vsel %vm30_vm0, %v15_v0, -inf  ;;  %v112_v2 = vmov 0   ;;  %v16_v3 = vld [vmem:[%s158_s0] sm:$0xff]  ;;  %v24_v7 = vlaneseq  ;;  %vm51_vm2 = vcmask 7168  }
   0x3   :  { %95 = vset.pattern.permute.xlu0 %v112_v2  ;;  %v17_v19 = vld [vmem:[%s159_s1] sm:$0xff]  ;;  %s100_s19 = scalar_lea.hbm %s161_s3, 16 }
   0x4   :  { %32 = vmax.xlane.f32.xlu0 %v31_v1  ;;  %v25_v8 = vand.u32 127, %v24_v7  ;;  %v64_v23 = vsel %vm51_vm2, %v17_v19, 0.0  ;;  %p101_p0 = scmp.ne.s32.totalorder %s161_s3, %s100_s19  ;;  %p104_p1 = scmp.lt.u32.totalorder %s100_s19, %s161_s3 }
   0x6   :  { %p106_p2 = pnand %p104_p1, %p101_p0 }
  0x1a   :  { %27 = vperm.xlu0 %95, %v16_v3  }
  0x91   :  { %v33_v4 = vpop.xlane.xlu0 %32 }
  0x92   :  { %v34_v5 = vsub.f32 %v15_v0, %v33_v4 }
  0x94   :  { %v35_v6 = vmul.f32 1.442695, %v34_v5 }
  0x96   :  { %96 = vpow2.f32 %v35_v6 }
  0x99   :  { %v28_v9 = vpop.permute.xlu0 %27 }
  0x9a   :  { %vm29_vm1 = vcmp.eq.s32.totalorder %v25_v8, %v28_v9 }
  0x9b   :  { %v43_v11 = vsel %vm29_vm1, %v15_v0, 0.0 }
  0x9c   :  { %v44_v13 = vsel %vm30_vm0, %v43_v11, 0.0 }
  0xa0   :  { %v97_v10 = vpop.eup %96 }
  0xa1   :  { %v37_v12 = vsel %vm30_vm0, %v97_v10, 0.0 }
  0xa2   :  { %38 = vadd.xlane.f32.xlu1 %v37_v12 }
  0xa6   :  { %45 = vadd.xlane.f32.xlu1 %v44_v13 }
 0x12f   :  { %v39_v14 = vpop.xlane.xlu1 %38 }
 0x130   :  { %98 = vlog2.f32 %v39_v14 }
 0x133   :  { %v46_v17 = vpop.xlane.xlu1 %45 }
 0x13a   :  { %v99_v15 = vpop.eup %98 }
 0x13b   :  { %v41_v16 = vmul.f32 0.6931472, %v99_v15 }
 0x13d   :  { %v42_v18 = vadd.f32 %v41_v16, %v33_v4 }
 0x13f   :  { %v48_v20 = vsub.f32 %v42_v18, %v46_v17 }
 0x141   :  { %v49_v21 = vmul.f32 %v48_v20, %v17_v19 }
 0x143   :  { %v52_v22 = vsel %vm51_vm2, %v49_v21, 0.0 }
 0x144   :  { %53 = vadd.xlane.f32.xlu1 %v52_v22 }
 0x148   :  { %65 = vadd.xlane.f32.xlu1 %v64_v23 }
 0x1d1   :  { %v54_v24 = vpop.xlane.xlu1 %53 }
 0x1d2   :  { %v55_v25 = vrot.slane %v54_v24, 4 }
 0x1d4   :  { %v56_v26 = vadd.f32 %v55_v25, %v54_v24 }
 0x1d5   :  { %v66_v27 = vpop.xlane.xlu1 %65 }
 0x1d6   :  { %v57_v28 = vrot.slane %v56_v26, 2  ;;  %v67_v29 = vrot.slane %v66_v27, 4 }
 0x1d8   :  { %v68_v30 = vadd.f32 %v67_v29, %v66_v27  ;;  %v58_v31 = vadd.f32 %v57_v28, %v56_v26 }
 0x1da   :  { %v69_v32 = vrot.slane %v68_v30, 2  ;;  %v59_v33 = vrot.slane %v58_v31, 1 }
 0x1dc   :  { %v70_v34 = vadd.f32 %v69_v32, %v68_v30  ;;  %v60_v35 = vadd.f32 %v59_v33, %v58_v31 }
 0x1de   :  { %89 = vpush %v60_v35  ;;  %v71_v36 = vrot.slane %v70_v34, 1 }
 0x1e0   :  { %v72_v37 = vadd.f32 %v71_v36, %v70_v34 }
 0x1e2   :  { %91 = vpush %v72_v37 }
 0x20f   :  { %s90_s1 = spop %89 }
 0x210   :  { %63 = sst [smem:[#allocation2]] %s90_s1 }
 0x213   :  { %s92_s16 = spop %91 }
 0x214   :  { %75 = sst [smem:[#allocation2 + $0x1]] %s92_s16 }
 0x215   :  { %109 = shalt.err (!%p106_p2)
}
 0x216   :  { %s113_s24 = smov [#allocation2]  }
 0x217   :  { %83 = dma.smem_to_hbm %s113_s24, 16, %s161_s3, [#allocation3]  }
 0x218   :  { %110 = dma.done.wait [#allocation3], 16  }
 0x219   :  { %111 = vsyncadd [#allocation3], 4294967280 }
 0x21a   :  { %87 = sfence }
 0x21b   :  { %88 = vsyncpa [#allocation3], 1 }

</bundles_post_ra>
